<compile_context>
chip_gen: v5e
topology: v5e:2x2
jax: 0.10.0
libtpu: 0.0.40
codegen_flags: <defaults>
</compile_context>

<pallas_src>
import functools
import math

import jax
import jax.numpy as jnp
from jax.experimental import pallas as pl
from jax.experimental.pallas import tpu as pltpu


def _round_up(n, m):
    return ((n + m - 1) // m) * m


def _augru_kernel(x_ref, hx_ref, attn_ref, wx_ref, wh_ref, bx_ref, bh_ref,
                  out_ref, *, hp):
    """One batch tile of the AUGRU cell.

    Two dense GEMMs (no zero-padded weight blocks), f32 accumulation; all gate
    math runs in f32 on the VPU/EUP.  hx stays f32 and is reused for both the
    gh GEMM operand (cast in-register) and the residual blend.
    """
    hx = hx_ref[...]                                                  # (tb, Hp) f32

    gx = jnp.dot(x_ref[...], wx_ref[...],
                 preferred_element_type=jnp.float32) + bx_ref[...]    # (tb, 3*Hp)
    gh = jnp.dot(hx.astype(wh_ref.dtype), wh_ref[...],
                 preferred_element_type=jnp.float32) + bh_ref[...]    # (tb, 3*Hp)

    attn = attn_ref[...]                                              # (tb, 1)
    update = jax.nn.sigmoid(gx[:, 0 * hp:1 * hp] + gh[:, 0 * hp:1 * hp]) * attn
    reset = jax.nn.sigmoid(gx[:, 1 * hp:2 * hp] + gh[:, 1 * hp:2 * hp])
    new = jnp.tanh(gx[:, 2 * hp:3 * hp] + reset * gh[:, 2 * hp:3 * hp])

    out_ref[...] = (hx + update * (new - hx)).astype(out_ref.dtype)


def augru_cell(x, hx, attn, wx, bx, wh, bh, *, tile_b=512,
               matmul_dtype=jnp.bfloat16, out_dtype=jnp.float32):
    """Pallas AUGRUCell forward.

    x: (B, I), hx: (B, H), attn: (B,)
    Torch-layout params: wx: (3H, I), bx: (3H,), wh: (3H, H), bh: (3H,)
    Returns hy: (B, H) in `out_dtype`.

    matmul_dtype controls only the GEMM operand dtype (x, hx-copy, weights);
    accumulation, biases, attn and the residual blend stay f32.
    """
    B, I = x.shape
    H = hx.shape[1]
    Hp = _round_up(H, 128)      # lane-aligned per-gate width
    Gp = 3 * Hp                 # [u | r | n]

    # ---- one-time parameter reshaping (would live in model init in real DIEN) ----
    f32 = jnp.float32
    wx = wx.astype(f32); wh = wh.astype(f32)
    bx = bx.astype(f32); bh = bh.astype(f32)

    def pad_cols(a):            # pad last dim H -> Hp
        return jnp.pad(a, ((0, 0), (0, Hp - H)))

    # x2h weight, (I, 3*Hp): columns [u | r | n]
    wx3 = jnp.concatenate([pad_cols(wx[:H].T),
                           pad_cols(wx[H:2 * H].T),
                           pad_cols(wx[2 * H:].T)], axis=1)
    # h2h weight, (Hp, 3*Hp): rows padded H -> Hp (zero rows match hx's zero pad cols)
    def pad_hh(a):
        return jnp.pad(a, ((0, Hp - H), (0, Hp - H)))
    wh3 = jnp.concatenate([pad_hh(wh[:H].T),
                           pad_hh(wh[H:2 * H].T),
                           pad_hh(wh[2 * H:].T)], axis=1)

    def pad_b(v):
        return jnp.pad(v, (0, Hp - H))
    bx3 = jnp.concatenate([pad_b(bx[:H]), pad_b(bx[H:2 * H]),
                           pad_b(bx[2 * H:])]).reshape(1, Gp)
    bh3 = jnp.concatenate([pad_b(bh[:H]), pad_b(bh[H:2 * H]),
                           pad_b(bh[2 * H:])]).reshape(1, Gp)

    wx3 = wx3.astype(matmul_dtype)
    wh3 = wh3.astype(matmul_dtype)

    # ---- adaptive batch tiling ----
    align = 16                                   # fine for bf16 packing and f32
    n_steps = max(1, -(-B // tile_b))            # ceil(B / tile_b)
    # v7x: shard the "parallel" batch axis across both TensorCores when B is
    # large enough that splitting doesn't shrink tiles below the mem-bound
    # sweet spot (v5e/v6e have one TC; the extra grid step is ~0.35 us).
    if n_steps == 1 and B >= 256:
        n_steps = 2
    tb = _round_up(-(-B // n_steps), align)
    Bp = tb * n_steps

    x_p = jnp.pad(x.astype(f32), ((0, Bp - B), (0, 0))).astype(matmul_dtype)  # (Bp, I)
    hx_p = jnp.pad(hx.astype(f32), ((0, Bp - B), (0, Hp - H)))                # (Bp, Hp) f32
    attn_p = jnp.pad(attn.reshape(B, 1).astype(f32), ((0, Bp - B), (0, 0)))   # (Bp, 1)

    # ---- VMEM budget: resident weights/biases + double-buffered streams ----
    mm_bytes = jnp.dtype(matmul_dtype).itemsize
    out_bytes = jnp.dtype(out_dtype).itemsize
    w_bytes = (I * Gp + Hp * Gp) * mm_bytes + 2 * Gp * 4
    io_bytes = tb * I * mm_bytes + tb * Hp * 4 + tb * 4 + tb * Hp * out_bytes
    vmem_needed = 2 * (w_bytes + io_bytes)       # conservative: double-buffer all
    vmem_limit = min(max(vmem_needed + (2 << 20), 32 << 20), 64 << 20)

    kernel = functools.partial(_augru_kernel, hp=Hp)
    grid = (Bp // tb,)

    out = pl.pallas_call(
        kernel,
        out_shape=jax.ShapeDtypeStruct((Bp, Hp), out_dtype),
        grid=grid,
        in_specs=[
            pl.BlockSpec((tb, I), lambda i: (i, 0)),    # x tile, pipelined
            pl.BlockSpec((tb, Hp), lambda i: (i, 0)),   # hx tile (f32), pipelined
            pl.BlockSpec((tb, 1), lambda i: (i, 0)),    # attn tile
            pl.BlockSpec((I, Gp), lambda i: (0, 0)),    # x2h weight, VMEM-resident
            pl.BlockSpec((Hp, Gp), lambda i: (0, 0)),   # h2h weight, VMEM-resident
            pl.BlockSpec((1, Gp), lambda i: (0, 0)),    # x2h bias
            pl.BlockSpec((1, Gp), lambda i: (0, 0)),    # h2h bias
        ],
        out_specs=pl.BlockSpec((tb, Hp), lambda i: (i, 0)),
        compiler_params=pltpu.CompilerParams(
            dimension_semantics=("parallel",),
            vmem_limit_bytes=int(vmem_limit),
        ),
    )(x_p, hx_p, attn_p, wx3, wh3, bx3, bh3)

    return out[:B, :H]


def _torch_linear_init(key, out_features, in_features):
    """Deterministic init matching nn.Linear defaults: U(-1/sqrt(fan_in), ...)."""
    k1, k2 = jax.random.split(key)
    bound = 1.0 / math.sqrt(in_features)
    w = jax.random.uniform(k1, (out_features, in_features), jnp.float32, -bound, bound)
    b = jax.random.uniform(k2, (out_features,), jnp.float32, -bound, bound)
    return w, b


def _reference(x, hx, attn, wx, bx, wh, bh):
    """Pure-JAX reference mirroring the PyTorch forward (torch weight layout)."""
    gate_x = x @ wx.T + bx
    gate_h = hx @ wh.T + bh
    H = hx.shape[1]
    i_u, i_r, i_n = gate_x[:, :H], gate_x[:, H:2 * H], gate_x[:, 2 * H:]
    h_u, h_r, h_n = gate_h[:, :H], gate_h[:, H:2 * H], gate_h[:, 2 * H:]
    update_gate = jax.nn.sigmoid(i_u + h_u) * attn[:, None]
    reset_gate = jax.nn.sigmoid(i_r + h_r)
    new_gate = jnp.tanh(i_n + reset_gate * h_n)
    return hx + update_gate * (new_gate - hx)


if __name__ == "__main__":
    B = 8            # batch
    INPUT_SIZE = 16  # input feature dim
    HIDDEN = 32      # hidden size

    key = jax.random.PRNGKey(0)
    kx, kh, kattn, kwx, kwh = jax.random.split(key, 5)

    x = jax.random.normal(kx, (B, INPUT_SIZE), jnp.float32)
    hx = jax.random.normal(kh, (B, HIDDEN), jnp.float32)
    attn = jax.random.uniform(kattn, (B,), jnp.float32)

    # x2h: Linear(INPUT_SIZE, 3*HIDDEN); h2h: Linear(HIDDEN, 3*HIDDEN)
    wx, bx = _torch_linear_init(kwx, 3 * HIDDEN, INPUT_SIZE)   # (3H, I), (3H,)
    wh, bh = _torch_linear_init(kwh, 3 * HIDDEN, HIDDEN)       # (3H, H), (3H,)

    hy_ref = _reference(x, hx, attn, wx, bx, wh, bh)

    # Default fast path: bf16 GEMM operands (f32 accumulation / gate math).
    hy_bf16 = jax.block_until_ready(augru_cell(x, hx, attn, wx, bx, wh, bh))
    assert hy_bf16.shape == (B, HIDDEN)
    assert jnp.allclose(hy_bf16, hy_ref, atol=3e-2, rtol=3e-2), "bf16 mismatch vs reference"

    # Full-f32 GEMM path for a tight reference check.
    hy_f32 = jax.block_until_ready(
        augru_cell(x, hx, attn, wx, bx, wh, bh, matmul_dtype=jnp.float32))
    assert jnp.allclose(hy_f32, hy_ref, atol=2e-5, rtol=2e-5), "f32 mismatch vs reference"

    print("KERNEL_OK")
</pallas_src>

<mosaic_0001>
module attributes {stable_mosaic.version = 11 : i64} {
  func.func @_augru_kernel(%arg0: i32, %arg1: memref<16x16xbf16, #tpu.memory_space<vmem>>, %arg2: memref<16x128xf32, #tpu.memory_space<vmem>>, %arg3: memref<16x1xf32, #tpu.memory_space<vmem>>, %arg4: memref<16x384xbf16, #tpu.memory_space<vmem>>, %arg5: memref<128x384xbf16, #tpu.memory_space<vmem>>, %arg6: memref<1x384xf32, #tpu.memory_space<vmem>>, %arg7: memref<1x384xf32, #tpu.memory_space<vmem>>, %arg8: memref<16x128xf32, #tpu.memory_space<vmem>>) attributes {dimension_semantics = [#tpu.dimension_semantics<parallel>], iteration_bounds = array<i64: 1>, scalar_prefetch = 0 : i64, scratch_operands = 0 : i64, tpu.core_type = #tpu.core_type<tc>, window_params = [{transform_indices = @transform_0, window_bounds = array<i64: 16, 16>}, {transform_indices = @transform_1, window_bounds = array<i64: 16, 128>}, {transform_indices = @transform_2, window_bounds = array<i64: 16, 1>}, {pipeline_mode = #tpu.pipeline_mode<synchronous>, transform_indices = @transform_3, window_bounds = array<i64: 16, 384>}, {pipeline_mode = #tpu.pipeline_mode<synchronous>, transform_indices = @transform_4, window_bounds = array<i64: 128, 384>}, {pipeline_mode = #tpu.pipeline_mode<synchronous>, transform_indices = @transform_5, window_bounds = array<i64: 1, 384>}, {pipeline_mode = #tpu.pipeline_mode<synchronous>, transform_indices = @transform_6, window_bounds = array<i64: 1, 384>}, {transform_indices = @transform_7, window_bounds = array<i64: 16, 128>}]} {
    %c0 = arith.constant 0 : index
    %c0_0 = arith.constant 0 : index
    %0 = vector.load %arg2[%c0, %c0_0] : memref<16x128xf32, #tpu.memory_space<vmem>>, vector<16x128xf32>
    %c0_1 = arith.constant 0 : index
    %c0_2 = arith.constant 0 : index
    %1 = vector.load %arg1[%c0_1, %c0_2] : memref<16x16xbf16, #tpu.memory_space<vmem>>, vector<16x16xbf16>
    %c0_3 = arith.constant 0 : index
    %c0_4 = arith.constant 0 : index
    %2 = vector.load %arg4[%c0_3, %c0_4] : memref<16x384xbf16, #tpu.memory_space<vmem>>, vector<16x384xbf16>
    %cst = arith.constant dense<0.000000e+00> : vector<16x384xf32>
    %3 = tpu.matmul %1, %2, %cst {dimension_numbers = #tpu.dot_dimension_numbers<[1], [0], [0], [1], [0, 0, 1, 1], [], []>} : vector<16x16xbf16>, vector<16x384xbf16>, vector<16x384xf32> -> vector<16x384xf32>
    %c0_5 = arith.constant 0 : index
    %c0_6 = arith.constant 0 : index
    %4 = vector.load %arg6[%c0_5, %c0_6] : memref<1x384xf32, #tpu.memory_space<vmem>>, vector<1x384xf32>
    %5 = vector.broadcast %4 : vector<1x384xf32> to vector<16x384xf32>
    %6 = arith.addf %3, %5 : vector<16x384xf32>
    %7 = arith.truncf %0 : vector<16x128xf32> to vector<16x128xbf16>
    %c0_7 = arith.constant 0 : index
    %c0_8 = arith.constant 0 : index
    %8 = vector.load %arg5[%c0_7, %c0_8] : memref<128x384xbf16, #tpu.memory_space<vmem>>, vector<128x384xbf16>
    %cst_9 = arith.constant dense<0.000000e+00> : vector<16x384xf32>
    %9 = tpu.matmul %7, %8, %cst_9 {dimension_numbers = #tpu.dot_dimension_numbers<[1], [0], [0], [1], [0, 0, 1, 1], [], []>} : vector<16x128xbf16>, vector<128x384xbf16>, vector<16x384xf32> -> vector<16x384xf32>
    %c0_10 = arith.constant 0 : index
    %c0_11 = arith.constant 0 : index
    %10 = vector.load %arg7[%c0_10, %c0_11] : memref<1x384xf32, #tpu.memory_space<vmem>>, vector<1x384xf32>
    %11 = vector.broadcast %10 : vector<1x384xf32> to vector<16x384xf32>
    %12 = arith.addf %9, %11 : vector<16x384xf32>
    %c0_12 = arith.constant 0 : index
    %c0_13 = arith.constant 0 : index
    %13 = vector.load %arg3[%c0_12, %c0_13] : memref<16x1xf32, #tpu.memory_space<vmem>>, vector<16x1xf32>
    %14 = vector.extract_strided_slice %6 {offsets = [0, 0], sizes = [16, 128], strides = [1, 1]} : vector<16x384xf32> to vector<16x128xf32>
    %15 = vector.extract_strided_slice %12 {offsets = [0, 0], sizes = [16, 128], strides = [1, 1]} : vector<16x384xf32> to vector<16x128xf32>
    %16 = arith.addf %14, %15 : vector<16x128xf32>
    %17 = arith.negf %16 : vector<16x128xf32>
    %18 = math.exp %17 : vector<16x128xf32>
    %cst_14 = arith.constant 1.000000e+00 : f32
    %19 = vector.broadcast %cst_14 : f32 to vector<16x128xf32>
    %20 = arith.addf %19, %18 : vector<16x128xf32>
    %21 = arith.divf %19, %20 : vector<16x128xf32>
    %22 = vector.broadcast %13 : vector<16x1xf32> to vector<16x128xf32>
    %23 = arith.mulf %21, %22 : vector<16x128xf32>
    %24 = vector.extract_strided_slice %6 {offsets = [0, 128], sizes = [16, 128], strides = [1, 1]} : vector<16x384xf32> to vector<16x128xf32>
    %25 = vector.extract_strided_slice %12 {offsets = [0, 128], sizes = [16, 128], strides = [1, 1]} : vector<16x384xf32> to vector<16x128xf32>
    %26 = arith.addf %24, %25 : vector<16x128xf32>
    %27 = arith.negf %26 : vector<16x128xf32>
    %28 = math.exp %27 : vector<16x128xf32>
    %cst_15 = arith.constant 1.000000e+00 : f32
    %29 = vector.broadcast %cst_15 : f32 to vector<16x128xf32>
    %30 = arith.addf %29, %28 : vector<16x128xf32>
    %31 = arith.divf %29, %30 : vector<16x128xf32>
    %32 = vector.extract_strided_slice %6 {offsets = [0, 256], sizes = [16, 128], strides = [1, 1]} : vector<16x384xf32> to vector<16x128xf32>
    %33 = vector.extract_strided_slice %12 {offsets = [0, 256], sizes = [16, 128], strides = [1, 1]} : vector<16x384xf32> to vector<16x128xf32>
    %34 = arith.mulf %31, %33 : vector<16x128xf32>
    %35 = arith.addf %32, %34 : vector<16x128xf32>
    %36 = math.tanh %35 : vector<16x128xf32>
    %37 = arith.subf %36, %0 : vector<16x128xf32>
    %38 = arith.mulf %23, %37 : vector<16x128xf32>
    %39 = arith.addf %0, %38 : vector<16x128xf32>
    %c0_16 = arith.constant 0 : index
    %c0_17 = arith.constant 0 : index
    %40 = vector.load %arg8[%c0_16, %c0_17] : memref<16x128xf32, #tpu.memory_space<vmem>>, vector<16x128xf32>
    tpu.vector_store %arg8[%c0_16, %c0_17], %39 {strides = array<i32>} : memref<16x128xf32, #tpu.memory_space<vmem>>, vector<16x128xf32>,
    return
  }
  func.func @transform_0(%arg0: i32) -> (i32, i32) {
    %c0_i32 = arith.constant 0 : i32
    %c0_i32_0 = arith.constant 0 : i32
    return %arg0, %c0_i32 : i32, i32
  }
  func.func @transform_1(%arg0: i32) -> (i32, i32) {
    %c0_i32 = arith.constant 0 : i32
    %c0_i32_0 = arith.constant 0 : i32
    return %arg0, %c0_i32 : i32, i32
  }
  func.func @transform_2(%arg0: i32) -> (i32, i32) {
    %c0_i32 = arith.constant 0 : i32
    %c0_i32_0 = arith.constant 0 : i32
    return %arg0, %c0_i32 : i32, i32
  }
  func.func @transform_3(%arg0: i32) -> (i32, i32) {
    %c0_i32 = arith.constant 0 : i32
    %c0_i32_0 = arith.constant 0 : i32
    %c0_i32_1 = arith.constant 0 : i32
    return %c0_i32, %c0_i32_0 : i32, i32
  }
  func.func @transform_4(%arg0: i32) -> (i32, i32) {
    %c0_i32 = arith.constant 0 : i32
    %c0_i32_0 = arith.constant 0 : i32
    %c0_i32_1 = arith.constant 0 : i32
    return %c0_i32, %c0_i32_0 : i32, i32
  }
  func.func @transform_5(%arg0: i32) -> (i32, i32) {
    %c0_i32 = arith.constant 0 : i32
    %c0_i32_0 = arith.constant 0 : i32
    %c0_i32_1 = arith.constant 0 : i32
    return %c0_i32, %c0_i32_0 : i32, i32
  }
  func.func @transform_6(%arg0: i32) -> (i32, i32) {
    %c0_i32 = arith.constant 0 : i32
    %c0_i32_0 = arith.constant 0 : i32
    %c0_i32_1 = arith.constant 0 : i32
    return %c0_i32, %c0_i32_0 : i32, i32
  }
  func.func @transform_7(%arg0: i32) -> (i32, i32) {
    %c0_i32 = arith.constant 0 : i32
    %c0_i32_0 = arith.constant 0 : i32
    return %arg0, %c0_i32 : i32, i32
  }
}

</mosaic_0001>

<bundles_post_ra>
// kernel: tpu_custom_call.1
= control target key start
LH: loop header
LB: loop body
LE: loop exit
PB: predicated region body
PF: predicated region fallthrough
CT: control target
= control target key end

     0   :  { %12 = vsyncpa [#allocation3], 0  ;;  %s950_s0 = inlined_call_operand.hbm [shape: bf16[16,16], index: 0, kind: input, shape index: {}]   ;;  %s951_s1 = inlined_call_operand.vmem [shape: f32[16,128], index: 1, kind: input, shape index: {}]   ;;  %s952_s2 = inlined_call_operand.vmem [shape: f32[16,1], index: 2, kind: input, shape index: {}]   ;;  %s953_s3 = inlined_call_operand.hbm [shape: bf16[16,384], index: 3, kind: input, shape index: {}]   ;;  %s954_s4 = inlined_call_operand.hbm [shape: bf16[128,384], index: 4, kind: input, shape index: {}]   ;;  %s955_s5 = inlined_call_operand.vmem [shape: f32[1,384], index: 5, kind: input, shape index: {}]   ;;  %s956_s6 = inlined_call_operand.hbm [shape: f32[1,384], index: 6, kind: input, shape index: {}]   ;;  %s957_s7 = inlined_call_operand.hbm [shape: f32[16,128], index: 7, kind: output, shape index: {}]  }
   0x1   :  { %13 = vsyncpa [#allocation6], 0 }
   0x2   :  { %14 = vsyncpa [#allocation9], 0  ;;  %s37_s26 = sshll.u32 %s953_s3, 4  ;;  %s38_s26 = int_to_ptr.hbm [resolvable:$true] %s37_s26 }
   0x3   :  { %15 = vsyncpa [#allocation4], 0  ;;  %s820_s27 = smov [#allocation5]   ;;  %s20_s8 = sshll.u32 %s950_s0, 4  ;;  %s21_s8 = int_to_ptr.hbm [resolvable:$true] %s20_s8 }
   0x4   :  { %s39_s28 = sshll.u32 %s820_s27, 4  ;;  %s821_s9 = smov 192   ;;  %s40_s28 = int_to_ptr.vmem [resolvable:$true] %s39_s28 }
   0x5   :  { %s822_s10 = smov 12   ;;  %s823_s11 = smov [#allocation2]  }
   0x6   :  { %45 = dma.hbm_to_vmem [thread:$0]  %s38_s26, 384, %s40_s28, [#allocation6], %s821_s9, %s821_s9, %s822_s10  }
   0x7   :  { %s22_s12 = sshll.u32 %s823_s11, 4  ;;  %s824_s13 = smov 64   ;;  %s23_s12 = int_to_ptr.vmem [resolvable:$true] %s22_s12 }
   0x8   :  { %s825_s14 = smov 4   ;;  %s50_s16 = sshll.u32 %s954_s4, 4  ;;  %s51_s16 = int_to_ptr.hbm [resolvable:$true] %s50_s16 }
   0x9   :  { %28 = dma.hbm_to_vmem [thread:$0]  %s21_s8, 128, %s23_s12, [#allocation3], %s824_s13, %s824_s13, %s825_s14  }
   0xa   :  { %s826_s17 = smov [#allocation7]   ;;  %s66_s20 = sshll.u32 %s956_s6, 4  ;;  %s67_s20 = int_to_ptr.hbm [resolvable:$true] %s66_s20 }
   0xb   :  { %s52_s18 = sshll.u32 %s826_s17, 4  ;;  %s827_s21 = smov [#allocation8]   ;;  %s53_s18 = int_to_ptr.vmem [resolvable:$true] %s52_s18 }
   0xc   :  { %58 = dma.hbm_to_vmem [thread:$0]  %s51_s16, 3072, %s53_s18, [#allocation6], %s821_s9, %s821_s9, %s822_s10  }
   0xd   :  { %s68_s22 = sshll.u32 %s827_s21, 4  ;;  %s69_s22 = int_to_ptr.vmem [resolvable:$true] %s68_s22 }
   0xe   :  { %71 = dma.hbm_to_vmem [thread:$0]  %s67_s20, 48, %s69_s22, [#allocation9]  }
   0xf   :  { %812 = dma.done.wait [#allocation3], 128  }
  0x10   :  { %813 = vsyncadd [#allocation3], 4294967168 }
  0x11   :  { %814 = dma.done.wait [#allocation6], 3456  }
  0x12   :  { %815 = vsyncadd [#allocation6], 4294963840 }
  0x13   :  { %816 = dma.done.wait [#allocation9], 48  }
  0x14   :  { %817 = vsyncadd [#allocation9], 4294967248  ;;  %v617_v0 = vld [vmem:[#allocation7 + $0xa8] sm:$0xf]  ;;  %v657_v1 = vld [vmem:[#allocation7 + $0xb0] sm:$0xf0] }
  0x15   :  { %v656_v2 = vld [vmem:[#allocation7 + $0xac] sm:$0xf]  ;;  %v618_v3 = vor.u32 %v657_v1, %v617_v0  ;;  %v619_v4 = vld [vmem:[#allocation7 + $0xb4] sm:$0xf0]  ;;  %v605_v5 = vld [vmem:[#allocation7 + $0x90] sm:$0xf] }
  0x16   :  { %v654_v6 = vld [vmem:[#allocation7 + $0x98] sm:$0xf0]  ;;  %v622_v7 = vor.u32 %v656_v2, %v619_v4  ;;  %v653_v8 = vld [vmem:[#allocation7 + $0x94] sm:$0xf]  ;;  %v607_v9 = vld [vmem:[#allocation7 + $0x9c] sm:$0xf0] }
  0x17   :  { %341 = vmatpush.bf16.msra.mxu3 %v618_v3  ;;  %v606_v10 = vor.u32 %v654_v6, %v605_v5  ;;  %v610_v11 = vor.u32 %v653_v8, %v607_v9  ;;  %v593_v12 = vld [vmem:[#allocation7 + $0x78] sm:$0xf]  ;;  %v651_v13 = vld [vmem:[#allocation7 + $0x80] sm:$0xf0]  ;;  %v650_v14 = vld [vmem:[#allocation7 + $0x7c] sm:$0xf] }
  0x18   :  { %355 = vmatpush.bf16.msra.mxu0 %v622_v7  ;;  %v595_v15 = vld [vmem:[#allocation7 + $0x84] sm:$0xf0]  ;;  %v632_v16 = vld [vmem:[#allocation5 + $0x4] sm:$0xf]  ;;  %v594_v17 = vor.u32 %v651_v13, %v593_v12  ;;  %v581_v18 = vld [vmem:[#allocation7 + $0x60] sm:$0xf] }
  0x19   :  { %v520_v19 = vld [vmem:[#allocation5 + $0xc] sm:$0xf0]  ;;  %v598_v20 = vor.u32 %v650_v14, %v595_v15  ;;  %v648_v21 = vld [vmem:[#allocation7 + $0x68] sm:$0xf0]  ;;  %v647_v22 = vld [vmem:[#allocation7 + $0x64] sm:$0xf] }
  0x1a   :  { %v523_v23 = vor.u32 %v632_v16, %v520_v19  ;;  %v625_v24 = vld [vmem:[#allocation7 + $0xb0] sm:$0xf]  ;;  %v658_v26 = vld [vmem:[#allocation7 + $0xb8] sm:$0xf0]  ;;  %v884_v27 = vld [vmem:[#allocation2] sm:$0xff]  ;;  %vm126_vm0 = vcmask 130048   ;;  %v582_v29 = vor.u32 %v648_v21, %v581_v18 }
  0x1b   :  { %342 = vmatpush.bf16.msra.mxu3 %v606_v10  ;;  %v583_v25 = vld [vmem:[#allocation7 + $0x6c] sm:$0xf0]  ;;  %v626_v28 = vor.u32 %v658_v26, %v625_v24  ;;  %v518_v30 = vld [vmem:[#allocation5] sm:$0xf]  ;;  %v633_v31 = vld [vmem:[#allocation5 + $0x8] sm:$0xf0] }
  0x1c   :  { %356 = vmatpush.bf16.msra.mxu0 %v610_v11  ;;  %151 = vmatpush.bf16.msra.mxu1 %v523_v23  ;;  %v613_v32 = vld [vmem:[#allocation7 + $0x98] sm:$0xf]  ;;  %v586_v33 = vor.u32 %v647_v22, %v583_v25  ;;  %v569_v34 = vld [vmem:[#allocation7 + $0x48] sm:$0xf]  ;;  %v645_v35 = vld [vmem:[#allocation7 + $0x50] sm:$0xf0]  ;;  %v519_v36 = vor.u32 %v633_v31, %v518_v30 }
  0x1d   :  { %v655_v37 = vld [vmem:[#allocation7 + $0xa0] sm:$0xf0]  ;;  %v644_v38 = vld [vmem:[#allocation7 + $0x4c] sm:$0xf]  ;;  %v571_v39 = vld [vmem:[#allocation7 + $0x54] sm:$0xf0]  ;;  %v570_v43 = vor.u32 %v645_v35, %v569_v34 }
  0x1e   :  { %v614_v40 = vor.u32 %v655_v37, %v613_v32  ;;  %v601_v41 = vld [vmem:[#allocation7 + $0x80] sm:$0xf]  ;;  %137 = vmatpush.bf16.msra.mxu2 %v519_v36  ;;  %v652_v42 = vld [vmem:[#allocation7 + $0x88] sm:$0xf0]  ;;  %v557_v44 = vld [vmem:[#allocation7 + $0x30] sm:$0xf]  ;;  %v574_v47 = vor.u32 %v644_v38, %v571_v39 }
  0x1f   :  { %343 = vmatpush.bf16.msra.mxu3 %v594_v17  ;;  %529 = vmatmul.msk.bf16.vlgmr.msra.gmra.mxu1 %vm126_vm0, %v884_v27  ;;  %v642_v45 = vld [vmem:[#allocation7 + $0x38] sm:$0xf0]  ;;  %v828_v46 = vmov 0   ;;  %v641_v48 = vld [vmem:[#allocation7 + $0x34] sm:$0xf]  ;;  %v602_v49 = vor.u32 %v652_v42, %v601_v41  ;;  %v383_v57 = vld [vmem:[%s952_s2] sm:$0xff] }
  0x20   :  { %357 = vmatpush.bf16.msra.mxu0 %v598_v20  ;;  %369 = vmatpush.bf16.msrb.mxu1 %v626_v28  ;;  %v526_v50 = vld [vmem:[#allocation5 + $0x8] sm:$0xf]  ;;  %v634_v51 = vld [vmem:[#allocation5 + $0x10] sm:$0xf0]  ;;  %v559_v52 = vld [vmem:[#allocation7 + $0x3c] sm:$0xf0]  ;;  %v558_v56 = vor.u32 %v642_v45, %v557_v44 }
  0x21   :  { %671 = vset.pattern.permute.xlu0 %v828_v46  ;;  %528 = vmatmul.msk.bf16.vlgmr.msra.gmra.mxu2 %vm126_vm0, %v884_v27  ;;  %v589_v53 = vld [vmem:[#allocation7 + $0x68] sm:$0xf]  ;;  %v649_v54 = vld [vmem:[#allocation7 + $0x70] sm:$0xf0]  ;;  %v527_v55 = vor.u32 %v634_v51, %v526_v50  ;;  %v562_v58 = vor.u32 %v641_v48, %v559_v52  ;;  %v545_v59 = vld [vmem:[#allocation7 + $0x18] sm:$0xf] }
  0x22   :  { %v639_v60 = vld [vmem:[#allocation7 + $0x20] sm:$0xf0]  ;;  %v638_v61 = vld [vmem:[#allocation7 + $0x1c] sm:$0xf]  ;;  %v590_v62 = vor.u32 %v649_v54, %v589_v53  ;;  %v547_v63 = vld [vmem:[#allocation7 + $0x24] sm:$0xf0]  ;;  %427 = vperm.xlu0 %671, %v383_v57  }
  0x23   :  { %344 = vmatpush.bf16.msra.mxu3 %v582_v29  ;;  %165 = vmatpush.bf16.msrb.mxu2 %v527_v55  ;;  %v577_v0 = vld [vmem:[#allocation7 + $0x50] sm:$0xf]  ;;  %v646_v1 = vld [vmem:[#allocation7 + $0x58] sm:$0xf0]  ;;  %v546_v2 = vor.u32 %v639_v60, %v545_v59  ;;  %v550_v3 = vor.u32 %v638_v61, %v547_v63  ;;  %v533_v4 = vld [vmem:[#allocation7] sm:$0xf] }
  0x24   :  { %358 = vmatpush.bf16.msra.mxu0 %v586_v33  ;;  %370 = vmatpush.bf16.msrb.mxu1 %v614_v40  ;;  %v636_v5 = vld [vmem:[#allocation7 + $0x8] sm:$0xf0]  ;;  %v635_v6 = vld [vmem:[#allocation7 + $0x4] sm:$0xf]  ;;  %v578_v7 = vor.u32 %v646_v1, %v577_v0  ;;  %v535_v8 = vld [vmem:[#allocation7 + $0xc] sm:$0xf0] }
  0x25   :  { %v565_v9 = vld [vmem:[#allocation7 + $0x38] sm:$0xf]  ;;  %v643_v10 = vld [vmem:[#allocation7 + $0x40] sm:$0xf0]  ;;  %v384_v11 = vld [vmem:[%s952_s2 + $0x8] sm:$0xff]  ;;  %v534_v12 = vor.u32 %v636_v5, %v533_v4  ;;  %v538_v15 = vor.u32 %v635_v6, %v535_v8  ;;  %s497_s9 = sshll.u32 %s957_s7, 4  ;;  %s498_s9 = int_to_ptr.hbm [resolvable:$true] %s497_s9 }
  0x26   :  { %v899_v13 = vld [vmem:[%s951_s1] sm:$0xff]  ;;  %v904_v14 = vld [vmem:[%s951_s1 + $0x8] sm:$0xff]  ;;  %v566_v16 = vor.u32 %v643_v10, %v565_v9  ;;  %v637_v22 = vld [vmem:[#allocation7 + $0x10] sm:$0xf0]  ;;  %s830_s10 = smov 128   ;;  %s831_s11 = smov 8  }
  0x27   :  { %345 = vmatpush.bf16.msra.mxu3 %v570_v43  ;;  %v553_v17 = vld [vmem:[#allocation7 + $0x20] sm:$0xf]  ;;  %v640_v18 = vld [vmem:[#allocation7 + $0x28] sm:$0xf0]  ;;  %v172_v19 = vpack.c.bf16 %v904_v14, %v899_v13  ;;  %v541_v21 = vld [vmem:[#allocation7 + $0x8] sm:$0xf] }
  0x28   :  { %359 = vmatpush.bf16.msra.mxu0 %v574_v47  ;;  %371 = vmatpush.bf16.msrb.mxu1 %v602_v49  ;;  %v554_v20 = vor.u32 %v640_v18, %v553_v17  ;;  %v542_v23 = vor.u32 %v637_v22, %v541_v21  ;;  %v913_v24 = vld [vmem:[%s955_s5] sm:$0x7]  ;;  %s829_s5 = smov [#allocation10]  }
  0x29   :  { %v915_v25 = vld [vmem:[#allocation8] sm:$0x7]  ;;  %v100_v26 = vperm.slane %v913_v24, 1  ;;  %v99_v31 = vperm.slane %v913_v24, 0  ;;  %s495_s29 = sshll.u32 %s829_s5, 4  ;;  %s496_s29 = int_to_ptr.vmem [resolvable:$true] %s495_s29 }
  0x2a   :  { %432 = vperm.xlu0 %671, %v384_v11   ;;  %v207_v34 = vperm.slane %v915_v25, 0 }
  0x2b   :  { %346 = vmatpush.bf16.msra.mxu3 %v558_v56 }
  0x2c   :  { %360 = vmatpush.bf16.msra.mxu0 %v562_v58  ;;  %372 = vmatpush.bf16.msrb.mxu1 %v590_v62  ;;  %v209_v62 = vperm.slane %v915_v25, 2 }
  0x2f   :  { %347 = vmatpush.bf16.msra.mxu3 %v546_v2 }
  0x30   :  { %361 = vmatpush.bf16.msra.mxu0 %v550_v3  ;;  %373 = vmatpush.bf16.msrb.mxu1 %v578_v7  ;;  %v101_v3 = vperm.slane %v913_v24, 2 }
  0x31   :  { %530 = vmatmul.msk.bf16.vlgmr.msrb.gmra.mxu2 %vm126_vm0, %v884_v27  ;;  %v208_v27 = vperm.slane %v915_v25, 1 }
  0x33   :  { %348 = vmatpush.bf16.msra.mxu3 %v534_v12 }
  0x34   :  { %362 = vmatpush.bf16.msra.mxu0 %v538_v15  ;;  %374 = vmatpush.bf16.msrb.mxu1 %v566_v16 }
  0x36   :  { %349 = vmatmul.bf16.vlgmr.msra.gmra.mxu3 %v172_v19 }
  0x37   :  { %363 = vmatmul.bf16.vlgmr.msra.gmra.mxu0 %v172_v19 }
  0x38   :  { %375 = vmatpush.bf16.msrb.mxu1 %v554_v20 }
  0x3c   :  { %376 = vmatpush.bf16.msrb.mxu1 %v542_v23 }
  0x3f   :  { %377 = vmatmul.bf16.vlgmr.msrb.gmra.mxu1 %v172_v19 }
  0x9c   :  { %v153_v28 = vpop.f32.mrf.mxu1 }
  0x9d   :  { %v154_v29 = vadd.f32 %v153_v28, %v100_v26 }
  0xa4   :  { %v139_v33 = vpop.f32.mrf.mxu2  ;;  %v155_v39 = vpop.f32.mrf.mxu1 }
  0xa5   :  { %v140_v36 = vadd.f32 %v139_v33, %v99_v31  ;;  %v156_v43 = vadd.f32 %v155_v39, %v100_v26 }
  0xac   :  { %v141_v47 = vpop.f32.mrf.mxu2 }
  0xad   :  { %v142_v52 = vadd.f32 %v141_v47, %v99_v31  ;;  %v428_v47 = vpop.permute.xlu0 %427 }
  0xb4   :  { %v364_v30 = vpop.f32.mrf.mxu0  ;;  %v167_v8 = vpop.f32.mrf.mxu2 }
  0xb5   :  { %v365_v32 = vadd.f32 %v364_v30, %v208_v27  ;;  %v168_v18 = vadd.f32 %v167_v8, %v101_v3 }
  0xb7   :  { %v437_v35 = vadd.f32 %v365_v32, %v154_v29 }
  0xb9   :  { %v629_v37 = vmul.f32 -1.442695, %v437_v35  ;;  %v350_v38 = vpop.f32.mrf.mxu3 }
  0xba   :  { %v351_v40 = vadd.f32 %v350_v38, %v207_v34 }
  0xbb   :  { %672 = vpow2.f32 %v629_v37 }
  0xbc   :  { %v385_v41 = vadd.f32 %v351_v40, %v140_v36  ;;  %v366_v42 = vpop.f32.mrf.mxu0  ;;  %v378_v1 = vpop.f32.mrf.mxu1 }
  0xbd   :  { %v367_v44 = vadd.f32 %v366_v42, %v208_v27  ;;  %v379_v10 = vadd.f32 %v378_v1, %v209_v62  ;;  %v169_v37 = vpop.f32.mrf.mxu2 }
  0xbe   :  { %v627_v45 = vmul.f32 -1.442695, %v385_v41 }
  0xbf   :  { %v438_v46 = vadd.f32 %v367_v44, %v156_v43 }
  0xc0   :  { %674 = vpow2.f32 %v627_v45 }
  0xc1   :  { %v673_v48 = vpop.eup %672  ;;  %v630_v49 = vmul.f32 -1.442695, %v438_v46  ;;  %v352_v50 = vpop.f32.mrf.mxu3  ;;  %v170_v46 = vadd.f32 %v169_v37, %v101_v3 }
  0xc2   :  { %v445_v51 = vadd.f32 1.0, %v673_v48  ;;  %v353_v53 = vadd.f32 %v352_v50, %v207_v34 }
  0xc3   :  { %676 = vpow2.f32 %v630_v49 }
  0xc4   :  { %678 = vrcp.f32 %v445_v51  ;;  %v386_v54 = vadd.f32 %v353_v53, %v142_v52  ;;  %v458_v2 = vand.u32 2147483648, %v445_v51  ;;  %v456_v7 = vand.u32 2147483647, %v445_v51  ;;  %v380_v31 = vpop.f32.mrf.mxu1 }
  0xc5   :  { %vm452_vm2 = vweird.f32 %v445_v51  ;;  %v381_v40 = vadd.f32 %v380_v31, %v209_v62  ;;  %v433_v62 = vpop.permute.xlu0 %432 }
  0xc6   :  { %v675_v55 = vpop.eup %674  ;;  %v628_v56 = vmul.f32 -1.442695, %v386_v54  ;;  %v459_v15 = vor.u32 1.1754944e-38, %v458_v2  ;;  %vm457_vm4 = vcmp.eq.f32.partialorder %v456_v7, 8.507059e+37 }
  0xc7   :  { %v921_v57 = vadd.f32 1.0, %v675_v55 }
  0xc8   :  { %680 = vpow2.f32 %v628_v56 }
  0xc9   :  { %v677_v58 = vpop.eup %676  ;;  %682 = vrcp.f32 %v921_v57  ;;  %v406_v26 = vand.u32 2147483648, %v921_v57  ;;  %vm400_vm7 = vweird.f32 %v921_v57  ;;  %v404_v32 = vand.u32 2147483647, %v921_v57 }
  0xca   :  { %v679_v59 = vpop.eup %678  ;;  %v446_v60 = vadd.f32 1.0, %v677_v58 }
  0xcb   :  { %v448_v61 = vmul.f32 %v679_v59, %v445_v51  ;;  %vm453_vm1 = vweird.f32 %v679_v59  ;;  %v407_v42 = vor.u32 1.1754944e-38, %v406_v26  ;;  %vm405_vm12 = vcmp.eq.f32.partialorder %v404_v32, 8.507059e+37 }
  0xcc   :  { %684 = vrcp.f32 %v446_v60  ;;  %vm454_vm3 = vmor %vm452_vm2, %vm453_vm1  ;;  %v473_v24 = vand.u32 2147483648, %v446_v60  ;;  %v471_v30 = vand.u32 2147483647, %v446_v60  ;;  %vm467_vm8 = vweird.f32 %v446_v60 }
  0xcd   :  { %v449_v63 = vsub.f32 1.0, %v448_v61 }
  0xce   :  { %v681_v0 = vpop.eup %680  ;;  %v474_v36 = vor.u32 1.1754944e-38, %v473_v24  ;;  %vm472_vm11 = vcmp.eq.f32.partialorder %v471_v30, 8.507059e+37 }
  0xcf   :  { %v683_v4 = vpop.eup %682  ;;  %v926_v5 = vadd.f32 1.0, %v681_v0  ;;  %v450_v6 = vmul.f32 %v679_v59, %v449_v63 }
  0xd0   :  { %v396_v9 = vmul.f32 %v683_v4, %v921_v57  ;;  %vm401_vm5 = vweird.f32 %v683_v4 }
  0xd1   :  { %686 = vrcp.f32 %v926_v5  ;;  %v451_v11 = vadd.f32 %v679_v59, %v450_v6  ;;  %vm934_vm9 = vmor %vm400_vm7, %vm401_vm5  ;;  %v421_v52 = vand.u32 2147483648, %v926_v5  ;;  %vm415_vm14 = vweird.f32 %v926_v5 }
  0xd2   :  { %v685_v12 = vpop.eup %684  ;;  %v397_v16 = vsub.f32 1.0, %v396_v9  ;;  %v419_v55 = vand.u32 2147483647, %v926_v5 }
  0xd3   :  { %v455_v17 = vsel %vm454_vm3, %v679_v59, %v451_v11  ;;  %v463_v19 = vmul.f32 %v685_v12, %v446_v60  ;;  %vm468_vm6 = vweird.f32 %v685_v12  ;;  %v422_v58 = vor.u32 1.1754944e-38, %v421_v52 }
  0xd4   :  { %v460_v20 = vsel %vm457_vm4, %v459_v15, %v455_v17  ;;  %v398_v21 = vmul.f32 %v683_v4, %v397_v16  ;;  %vm469_vm10 = vmor %vm467_vm8, %vm468_vm6  ;;  %vm420_vm0 = vcmp.eq.f32.partialorder %v419_v55, 8.507059e+37 }
  0xd5   :  { %v477_v22 = vmul.f32 %v460_v20, %v379_v10  ;;  %v464_v23 = vsub.f32 1.0, %v463_v19 }
  0xd6   :  { %v399_v25 = vadd.f32 %v683_v4, %v398_v21 }
  0xd7   :  { %v687_v28 = vpop.eup %686  ;;  %v479_v27 = vadd.f32 %v477_v22, %v168_v18  ;;  %v465_v29 = vmul.f32 %v685_v12, %v464_v23 }
  0xd8   :  { %v411_v33 = vmul.f32 %v687_v28, %v926_v5  ;;  %v403_v38 = vsel %vm934_vm9, %v683_v4, %v399_v25  ;;  %vm416_vm13 = vweird.f32 %v687_v28 }
  0xd9   :  { %688 = vtanh.f32 %v479_v27  ;;  %v466_v34 = vadd.f32 %v685_v12, %v465_v29  ;;  %v408_v48 = vsel %vm405_vm12, %v407_v42, %v403_v38  ;;  %vm417_vm15 = vmor %vm415_vm14, %vm416_vm13 }
  0xda   :  { %v412_v39 = vsub.f32 1.0, %v411_v33  ;;  %v435_v53 = vmul.f32 %v428_v47, %v408_v48 }
  0xdb   :  { %v470_v41 = vsel %vm469_vm10, %v685_v12, %v466_v34 }
  0xdc   :  { %v475_v43 = vsel %vm472_vm11, %v474_v36, %v470_v41  ;;  %v413_v44 = vmul.f32 %v687_v28, %v412_v39 }
  0xdd   :  { %v478_v45 = vmul.f32 %v475_v43, %v381_v40 }
  0xde   :  { %v414_v49 = vadd.f32 %v687_v28, %v413_v44 }
  0xdf   :  { %v689_v50 = vpop.eup %688  ;;  %v480_v51 = vadd.f32 %v478_v45, %v170_v46 }
  0xe0   :  { %v483_v54 = vsub.f32 %v689_v50, %v899_v13  ;;  %v418_v57 = vsel %vm417_vm15, %v687_v28, %v414_v49 }
  0xe1   :  { %690 = vtanh.f32 %v480_v51  ;;  %v423_v60 = vsel %vm420_vm0, %v422_v58, %v418_v57 }
  0xe2   :  { %v485_v56 = vmul.f32 %v483_v54, %v435_v53  ;;  %v436_v63 = vmul.f32 %v433_v62, %v423_v60 }
  0xe4   :  { %v487_v59 = vadd.f32 %v485_v56, %v899_v13 }
  0xe6   :  { %489 = vst [vmem:[#allocation10] sm:$0xff] %v487_v59 }
  0xe7   :  { %v691_v61 = vpop.eup %690 }
  0xe8   :  { %v484_v0 = vsub.f32 %v691_v61, %v904_v14 }
  0xea   :  { %v486_v1 = vmul.f32 %v484_v0, %v436_v63 }
  0xec   :  { %v488_v2 = vadd.f32 %v486_v1, %v904_v14 }
  0xee   :  { %490 = vst [vmem:[#allocation10 + $0x8] sm:$0xff] %v488_v2 }
  0xef   :  { %503 = dma.vmem_to_hbm [thread:$0]  %s496_s29, 256, %s498_s9, [#allocation4], %s830_s10, %s830_s10, %s831_s11  }
  0xf0   :  { %818 = dma.done.wait [#allocation4], 256  }
  0xf1   :  { %819 = vsyncadd [#allocation4], 4294967040 }
  0xf2   :  { %508 = vsyncpa [#allocation3], 1 }
  0xf3   :  { %509 = vsyncpa [#allocation6], 1 }
  0xf4   :  { %510 = vsyncpa [#allocation9], 1 }
  0xf5   :  { %511 = vsyncpa [#allocation4], 1 }

</bundles_post_ra>
